<compile_context>
chip_gen: v7x
topology: tpu7x:2x2x1
jax: 0.10.0
libtpu: 0.0.40
codegen_flags: <defaults>
</compile_context>

<pallas_src>
import functools

import jax
import jax.numpy as jnp
from jax.experimental import pallas as pl
from jax.experimental.pallas import tpu as pltpu


# ----------------------------------------------------------------------------
# Tiling helpers
# ----------------------------------------------------------------------------
_TM, _TN, _TK = 512, 512, 512   # 3-D matmul tiles (bf16 operands; ~7 MiB live)
_TK_LN = 2048                   # max feature dim for fused LayerNorm prologue


def _round_up(x, m):
    return ((x + m - 1) // m) * m


def _pad2(a, rows, cols):
    r, c = a.shape
    if r == rows and c == cols:
        return a
    return jnp.pad(a, ((0, rows - r), (0, cols - c)))


def _to_bf16(a):
    return a if a.dtype == jnp.bfloat16 else a.astype(jnp.bfloat16)


def _apply_act(y, act):
    if act == "relu":
        return jnp.maximum(y, 0.0)
    if act == "silu":
        return y * jax.nn.sigmoid(y)
    if act == "gelu":
        # TODO(synk): jax.nn.gelu defaults to tanh approximation; torch GELU is exact erf.
        return jax.nn.gelu(y)
    return y


# ----------------------------------------------------------------------------
# Pallas kernels
# ----------------------------------------------------------------------------
def _ln_prologue(x, g, b, k_real):
    """LayerNorm over the last dim; x may be zero-padded beyond k_real columns."""
    kp = x.shape[-1]
    inv_k = 1.0 / float(k_real)
    mu = jnp.sum(x, axis=-1, keepdims=True) * inv_k
    xc = x - mu
    if kp != k_real:   # mask padded columns out of the variance (two-pass, stable)
        mask = jax.lax.broadcasted_iota(jnp.int32, x.shape, x.ndim - 1) < k_real
        xv = jnp.where(mask, xc, 0.0)
    else:
        xv = xc
    var = jnp.sum(xv * xv, axis=-1, keepdims=True) * inv_k
    return xc * jax.lax.rsqrt(var + 1e-5) * g + b


def _mm_kernel(x_ref, w_ref, b_ref, o_ref, acc_ref, *, act):
    @pl.when(pl.program_id(2) == 0)
    def _():
        acc_ref[...] = jnp.zeros_like(acc_ref)

    acc_ref[...] += jnp.dot(x_ref[...], w_ref[...],
                            preferred_element_type=jnp.float32)

    @pl.when(pl.program_id(2) == pl.num_programs(2) - 1)
    def _():
        o_ref[...] = _apply_act(acc_ref[...] + b_ref[...], act).astype(o_ref.dtype)


def _mm_res_kernel(x_ref, w_ref, b_ref, r_ref, o_ref, acc_ref, *, act, res_scale):
    @pl.when(pl.program_id(2) == 0)
    def _():
        acc_ref[...] = jnp.zeros_like(acc_ref)

    acc_ref[...] += jnp.dot(x_ref[...], w_ref[...],
                            preferred_element_type=jnp.float32)

    @pl.when(pl.program_id(2) == pl.num_programs(2) - 1)
    def _():
        o_ref[...] = (r_ref[...] +
                      res_scale * _apply_act(acc_ref[...] + b_ref[...], act)
                      ).astype(o_ref.dtype)


def _mm_ln_kernel(x_ref, g_ref, bl_ref, w_ref, b_ref, o_ref, y_ref, *, act, k_real):
    # LN(x) computed once per M-tile (j == 0) into a bf16 scratch, reused for all N tiles.
    @pl.when(pl.program_id(1) == 0)
    def _():
        xf = x_ref[...].astype(jnp.float32)
        y_ref[...] = _ln_prologue(xf, g_ref[...], bl_ref[...], k_real
                                  ).astype(jnp.bfloat16)
    acc = jnp.dot(y_ref[...], w_ref[...], preferred_element_type=jnp.float32)
    o_ref[...] = _apply_act(acc + b_ref[...], act).astype(o_ref.dtype)


def _mm_glu_ln_kernel(x_ref, g_ref, bl_ref, wa_ref, wg_ref, ba_ref, bg_ref,
                      o_ref, y_ref, *, k_real):
    # LayerNorm -> pointwise conv1 -> GLU, all fused; LN reused across N tiles.
    @pl.when(pl.program_id(1) == 0)
    def _():
        xf = x_ref[...].astype(jnp.float32)
        y_ref[...] = _ln_prologue(xf, g_ref[...], bl_ref[...], k_real
                                  ).astype(jnp.bfloat16)
    y = y_ref[...]
    a = jnp.dot(y, wa_ref[...], preferred_element_type=jnp.float32) + ba_ref[...]
    gate = jnp.dot(y, wg_ref[...], preferred_element_type=jnp.float32) + bg_ref[...]
    o_ref[...] = (a * jax.nn.sigmoid(gate)).astype(o_ref.dtype)


def _ln_kernel(x_ref, g_ref, b_ref, o_ref):
    x = x_ref[...].astype(jnp.float32)
    mu = jnp.mean(x, axis=-1, keepdims=True)
    xc = x - mu
    var = jnp.mean(xc * xc, axis=-1, keepdims=True)
    o_ref[...] = (xc * jax.lax.rsqrt(var + 1e-5) * g_ref[...] + b_ref[...]
                  ).astype(o_ref.dtype)


def _attn_kernel(q_ref, k_ref, v_ref, o_ref, *, scale, t_real):
    # One (batch, head, q-tile) per grid step; head dim kept at its true size.
    q = (q_ref[0].astype(jnp.float32) * scale).astype(jnp.bfloat16)     # (tq, dh)
    k = k_ref[0]                                                        # (Tp, dh)
    v = v_ref[0]
    s = jax.lax.dot_general(q, k, (((1,), (1,)), ((), ())),
                            preferred_element_type=jnp.float32)         # (tq, Tp)
    if t_real < s.shape[-1]:     # mask zero-padded keys (static condition)
        key_ok = jax.lax.broadcasted_iota(jnp.int32, s.shape, 1) < t_real
        s = jnp.where(key_ok, s, -1e30)
    m = jnp.max(s, axis=-1, keepdims=True)
    p = jnp.exp(s - m)
    l = jnp.sum(p, axis=-1, keepdims=True)
    o = jnp.dot(p.astype(jnp.bfloat16), v, preferred_element_type=jnp.float32)
    o_ref[0] = (o * pl.reciprocal(l, approx=True)).astype(o_ref.dtype)
    # TODO(synk): for very long sequences, switch to a KV-tiled online-softmax variant.


def _dwconv_kernel(x_ref, w_ref, b_ref, g_ref, bb_ref, o_ref, *, K, T):
    x = x_ref[0].astype(jnp.float32)                   # (T+K-1, tc), loaded once
    acc = jnp.zeros((T, x.shape[1]), jnp.float32)
    for k in range(K):                                 # static unrolled taps
        acc = acc + x[k:k + T, :] * w_ref[k:k + 1, :]
    acc = acc + b_ref[...]
    acc = acc * g_ref[...] + bb_ref[...]               # BatchNorm1d eval (running stats 0/1)
    o_ref[0] = (acc * jax.nn.sigmoid(acc)).astype(o_ref.dtype)   # fused SiLU
    # TODO(synk): replace the shifted slices with pltpu.roll-based taps for very long T.


# ----------------------------------------------------------------------------
# Kernel wrappers
# ----------------------------------------------------------------------------
def layernorm(x, g, b):
    shp = x.shape
    D = shp[-1]
    x2 = x.reshape(-1, D).astype(jnp.float32)
    M = x2.shape[0]
    tm = min(_round_up(M, 8), 512)
    Mp = _round_up(M, tm)
    xp = jnp.pad(x2, ((0, Mp - M), (0, 0)))
    out = pl.pallas_call(
        _ln_kernel,
        out_shape=jax.ShapeDtypeStruct((Mp, D), jnp.float32),
        grid=(Mp // tm,),
        in_specs=[pl.BlockSpec((tm, D), lambda i: (i, 0)),
                  pl.BlockSpec((1, D), lambda i: (0, 0)),
                  pl.BlockSpec((1, D), lambda i: (0, 0))],
        out_specs=pl.BlockSpec((tm, D), lambda i: (i, 0)),
        compiler_params=pltpu.CompilerParams(dimension_semantics=("parallel",)),
    )(xp, g.reshape(1, D).astype(jnp.float32), b.reshape(1, D).astype(jnp.float32))
    return out[:M].reshape(shp)


def matmul(x, w, b, act="none", residual=None, res_scale=1.0, ln=None,
           out_dtype=jnp.float32):
    """o = [residual + res_scale*] act( LN?(x) @ w + b ).

    bf16 operands on the MXU, f32 accumulation.  The LayerNorm prologue is
    fused (and reused across N tiles) when K fits one tile.
    """
    M, K = x.shape
    N = w.shape[1]
    fuse_ln = (ln is not None and residual is None
               and _round_up(K, 128) <= _TK_LN)
    if ln is not None and not fuse_ln:
        x = layernorm(x, ln[0], ln[1])
    x = _to_bf16(x)

    tm = min(_round_up(M, 16), _TM)
    tn = min(_round_up(N, 128), _TN)
    tk = _round_up(K, 128) if fuse_ln else min(_round_up(K, 128), _TK)
    Mp, Np, Kp = _round_up(M, tm), _round_up(N, tn), _round_up(K, tk)

    xp = _pad2(x, Mp, Kp)
    wp = _to_bf16(_pad2(w, Kp, Np))
    bp = _pad2(b.reshape(1, N).astype(jnp.float32), 1, Np)

    if fuse_ln:
        gp = _pad2(ln[0].reshape(1, K).astype(jnp.float32), 1, Kp)
        blp = _pad2(ln[1].reshape(1, K).astype(jnp.float32), 1, Kp)
        out = pl.pallas_call(
            functools.partial(_mm_ln_kernel, act=act, k_real=K),
            out_shape=jax.ShapeDtypeStruct((Mp, Np), out_dtype),
            grid=(Mp // tm, Np // tn),
            in_specs=[pl.BlockSpec((tm, Kp), lambda i, j: (i, 0)),
                      pl.BlockSpec((1, Kp), lambda i, j: (0, 0)),
                      pl.BlockSpec((1, Kp), lambda i, j: (0, 0)),
                      pl.BlockSpec((Kp, tn), lambda i, j: (0, j)),
                      pl.BlockSpec((1, tn), lambda i, j: (0, j))],
            out_specs=pl.BlockSpec((tm, tn), lambda i, j: (i, j)),
            scratch_shapes=[pltpu.VMEM((tm, Kp), jnp.bfloat16)],
            compiler_params=pltpu.CompilerParams(
                dimension_semantics=("parallel", "arbitrary")),
        )(xp, gp, blp, wp, bp)
        return out[:M, :N]

    grid = (Mp // tm, Np // tn, Kp // tk)
    x_spec = pl.BlockSpec((tm, tk), lambda i, j, k: (i, k))
    w_spec = pl.BlockSpec((tk, tn), lambda i, j, k: (k, j))
    b_spec = pl.BlockSpec((1, tn), lambda i, j, k: (0, j))
    o_spec = pl.BlockSpec((tm, tn), lambda i, j, k: (i, j))
    scratch = [pltpu.VMEM((tm, tn), jnp.float32)]
    cp = pltpu.CompilerParams(
        dimension_semantics=("parallel", "parallel", "arbitrary"))

    if residual is None:
        out = pl.pallas_call(
            functools.partial(_mm_kernel, act=act),
            out_shape=jax.ShapeDtypeStruct((Mp, Np), out_dtype),
            grid=grid,
            in_specs=[x_spec, w_spec, b_spec],
            out_specs=o_spec,
            scratch_shapes=scratch,
            compiler_params=cp,
        )(xp, wp, bp)
    else:
        rp = _pad2(residual.astype(jnp.float32), Mp, Np)
        r_spec = pl.BlockSpec((tm, tn), lambda i, j, k: (i, j))
        out = pl.pallas_call(
            functools.partial(_mm_res_kernel, act=act, res_scale=res_scale),
            out_shape=jax.ShapeDtypeStruct((Mp, Np), out_dtype),
            grid=grid,
            in_specs=[x_spec, w_spec, b_spec, r_spec],
            out_specs=o_spec,
            scratch_shapes=scratch,
            compiler_params=cp,
        )(xp, wp, bp, rp)
    return out[:M, :N]


def matmul_glu(x, wa, wg, ba, bg, ln, out_dtype=jnp.float32):
    """o = GLU( LN(x) @ [wa|wg] + [ba|bg] ) fully fused (weights pre-split)."""
    M, K = x.shape
    N = wa.shape[1]
    if _round_up(K, 128) > _TK_LN:          # fallback: unfused when K is too large
        h = layernorm(x, ln[0], ln[1])
        a = matmul(h, wa, ba)
        g = matmul(h, wg, bg)
        return (a * jax.nn.sigmoid(g)).astype(out_dtype)

    x = _to_bf16(x)
    tm = min(_round_up(M, 16), _TM)
    tn = min(_round_up(N, 128), _TN)
    Kp = _round_up(K, 128)
    Mp, Np = _round_up(M, tm), _round_up(N, tn)

    xp = _pad2(x, Mp, Kp)
    wap = _to_bf16(_pad2(wa, Kp, Np))
    wgp = _to_bf16(_pad2(wg, Kp, Np))
    bap = _pad2(ba.reshape(1, N).astype(jnp.float32), 1, Np)
    bgp = _pad2(bg.reshape(1, N).astype(jnp.float32), 1, Np)
    gp = _pad2(ln[0].reshape(1, K).astype(jnp.float32), 1, Kp)
    blp = _pad2(ln[1].reshape(1, K).astype(jnp.float32), 1, Kp)

    out = pl.pallas_call(
        functools.partial(_mm_glu_ln_kernel, k_real=K),
        out_shape=jax.ShapeDtypeStruct((Mp, Np), out_dtype),
        grid=(Mp // tm, Np // tn),
        in_specs=[pl.BlockSpec((tm, Kp), lambda i, j: (i, 0)),
                  pl.BlockSpec((1, Kp), lambda i, j: (0, 0)),
                  pl.BlockSpec((1, Kp), lambda i, j: (0, 0)),
                  pl.BlockSpec((Kp, tn), lambda i, j: (0, j)),
                  pl.BlockSpec((Kp, tn), lambda i, j: (0, j)),
                  pl.BlockSpec((1, tn), lambda i, j: (0, j)),
                  pl.BlockSpec((1, tn), lambda i, j: (0, j))],
        out_specs=pl.BlockSpec((tm, tn), lambda i, j: (i, j)),
        scratch_shapes=[pltpu.VMEM((tm, Kp), jnp.bfloat16)],
        compiler_params=pltpu.CompilerParams(
            dimension_semantics=("parallel", "arbitrary")),
    )(xp, gp, blp, wap, wgp, bap, bgp)
    return out[:M, :N]


def attention(qkv, B, T, H, dh):
    """qkv: (B*T, 3*H*dh) bf16 -> (B*T, H*dh) bf16 attention output."""
    D = H * dh
    scale = 1.0 / (dh ** 0.5)
    x = _to_bf16(qkv).reshape(B, T, 3, H, dh)
    if T <= 128:
        tq, Tp = T, T
    else:
        tq = 128
        Tp = _round_up(T, tq)
    if Tp != T:
        x = jnp.pad(x, ((0, 0), (0, Tp - T), (0, 0), (0, 0), (0, 0)))
    # Single combined bf16 layout pass (no per-tensor f32 transposes, no dh padding).
    x = x.transpose(2, 0, 3, 1, 4).reshape(3 * B * H, Tp, dh)

    q_spec = pl.BlockSpec((1, tq, dh), lambda b, h, qi: (b * H + h, qi, 0))
    k_spec = pl.BlockSpec((1, Tp, dh), lambda b, h, qi: (B * H + b * H + h, 0, 0))
    v_spec = pl.BlockSpec((1, Tp, dh), lambda b, h, qi: (2 * B * H + b * H + h, 0, 0))
    o_spec = pl.BlockSpec((1, tq, dh), lambda b, h, qi: (b * H + h, qi, 0))

    out = pl.pallas_call(
        functools.partial(_attn_kernel, scale=scale, t_real=T),
        out_shape=jax.ShapeDtypeStruct((B * H, Tp, dh), jnp.bfloat16),
        grid=(B, H, Tp // tq),
        in_specs=[q_spec, k_spec, v_spec],
        out_specs=o_spec,
        compiler_params=pltpu.CompilerParams(
            dimension_semantics=("parallel", "parallel", "parallel")),
    )(x, x, x)
    o = out.reshape(B, H, Tp, dh)[:, :, :T, :]
    return o.transpose(0, 2, 1, 3).reshape(B * T, D)


def _pick_tc(C):
    for tc in (256, 128):
        if C % tc == 0:
            return tc
    return C


def depthwise_conv1d(x, w, b, bn_g, bn_b):
    """'same'-padded depthwise conv over time with fused BatchNorm(eval)+SiLU."""
    B, T, C = x.shape
    K = w.shape[0]
    pad_l = (K - 1) // 2
    pad_r = K - 1 - pad_l
    xp = jnp.pad(_to_bf16(x), ((0, 0), (pad_l, pad_r), (0, 0)))
    tc = _pick_tc(C)
    vec = lambda a: a.reshape(1, C).astype(jnp.float32)
    return pl.pallas_call(
        functools.partial(_dwconv_kernel, K=K, T=T),
        out_shape=jax.ShapeDtypeStruct((B, T, C), jnp.bfloat16),
        grid=(B, C // tc),
        in_specs=[pl.BlockSpec((1, T + K - 1, tc), lambda i, c: (i, 0, c)),
                  pl.BlockSpec((K, tc), lambda i, c: (0, c)),
                  pl.BlockSpec((1, tc), lambda i, c: (0, c)),
                  pl.BlockSpec((1, tc), lambda i, c: (0, c)),
                  pl.BlockSpec((1, tc), lambda i, c: (0, c))],
        out_specs=pl.BlockSpec((1, T, tc), lambda i, c: (i, 0, c)),
        compiler_params=pltpu.CompilerParams(
            dimension_semantics=("parallel", "parallel")),
    )(xp, w.astype(jnp.float32), vec(b), vec(bn_g), vec(bn_b))


# ----------------------------------------------------------------------------
# Model components (glue: reshapes, patch extraction, parameter plumbing)
# ----------------------------------------------------------------------------
def im2col_nhwc(x, kh, kw, stride):
    """x: (B, H, W, C) -> (B*Ho*Wo, kh*kw*C) patches (NHWC, no activation transposes)."""
    B, H, W, C = x.shape
    Ho = (H - kh) // stride + 1
    Wo = (W - kw) // stride + 1
    cols = []
    for i in range(kh):
        for j in range(kw):
            cols.append(x[:, i:i + stride * (Ho - 1) + 1:stride,
                              j:j + stride * (Wo - 1) + 1:stride, :])
    p = jnp.stack(cols, axis=3)                       # (B, Ho, Wo, kh*kw, C)
    return p.reshape(B * Ho * Wo, kh * kw * C), Ho, Wo
    # TODO(synk): patch extraction could move inside the conv matmul kernel to
    # avoid the kh*kw HBM inflation; kept in glue for robustness at these sizes.


def extractor_forward(x, p):
    """ConvolutionSubsampling: (B,T,F) -> (B,T',C*F') with two stride-2 convs + ReLU."""
    B = x.shape[0]
    h = x[:, :, :, None]                              # NHWC: (B, T, F, 1)
    for li, name in enumerate(("conv1", "conv2")):
        wm, bias = p[name]["wm"], p[name]["b"]        # wm pre-reshaped/cast in prepare_params
        kh, kw = p[name]["kh"], p[name]["kw"]
        cols, Ho, Wo = im2col_nhwc(h, kh, kw, 2)
        out_dtype = jnp.bfloat16 if li == 0 else jnp.float32
        out = matmul(cols, wm, bias, act="relu", out_dtype=out_dtype)
        h = out.reshape(B, Ho, Wo, wm.shape[1])
    B, Tp, Fp, C = h.shape
    return h.transpose(0, 1, 3, 2).reshape(B, Tp, C * Fp)      # (B, T', C*F'), C-major


def gumbel_quantizer_forward(x, p, num_groups, num_vars):
    """Eval-mode Gumbel quantizer: hard argmax codebook gather + diversity perplexity."""
    # TODO(synk): training-time Gumbel noise / temperature annealing not modeled (eval path).
    B, T, Din = x.shape
    N = B * T
    logits = matmul(x.reshape(N, Din), p["wp_w"], p["wp_b"])          # (N, G*V)
    logits_g = logits.reshape(N, num_groups, num_vars)
    ids = jnp.argmax(logits_g, axis=-1)                               # (N, G)
    code_dim = p["vars"].shape[-1]
    flat_ids = ids + jnp.arange(num_groups, dtype=ids.dtype)[None, :] * num_vars
    quantized = jnp.take(p["vars"], flat_ids, axis=0)                 # gather, no tiny matmuls
    quantized = quantized.reshape(B, T, num_groups * code_dim)
    probs = jax.nn.softmax(logits_g.astype(jnp.float32), axis=-1)     # tiny reduction, glue
    avg_probs = jnp.mean(probs, axis=0)                               # (G, V)
    prob_perplexity = jnp.sum(
        jnp.exp(-jnp.sum(avg_probs * jnp.log(avg_probs + 1e-7), axis=-1)))
    return quantized, ids.reshape(B, T, num_groups), prob_perplexity


def time_masking(x, key, n_masks, mask_param, ratio, zero_masking):
    """SpecAugment-style time masking (no_grad in torch)."""
    B, T, _ = x.shape
    max_len = min(mask_param, int(T * ratio))
    mask = jnp.zeros((B, T), dtype=bool)
    t_idx = jnp.arange(T)
    for _ in range(n_masks):
        key, k1, k2 = jax.random.split(key, 3)
        lengths = jnp.floor(jax.random.uniform(k1, (B,)) * (max_len + 1)).astype(jnp.int32)
        starts = jnp.floor(jax.random.uniform(k2, (B,)) *
                           (T - lengths + 1).astype(jnp.float32)).astype(jnp.int32)
        span = (t_idx[None, :] >= starts[:, None]) & (t_idx[None, :] < (starts + lengths)[:, None])
        mask = mask | span
    fill = 0.0 if zero_masking else jnp.mean(x)
    masked_x = jnp.where(mask[:, :, None], fill, x)
    return masked_x, mask


def ffn_forward(x, p, res_scale=0.5):
    """x + res_scale * Linear2(SiLU(Linear1(LN(x)))) — LN, SiLU, residual fused."""
    B, T, D = x.shape
    x2 = x.reshape(B * T, D)
    h = matmul(x2, p["w1"], p["b1"], act="silu", ln=(p["ln_g"], p["ln_b"]),
               out_dtype=jnp.bfloat16)
    h = matmul(h, p["w2"], p["b2"], residual=x2, res_scale=res_scale)
    return h.reshape(B, T, D)


def mhsa_forward(x, p, n_heads):
    """x + Wo(Attention(Q,K,V)) — LN fused into one QKV matmul, residual fused into Wo."""
    B, T, D = x.shape
    dh = D // n_heads
    x2 = x.reshape(B * T, D)
    qkv = matmul(x2, p["wqkv"], p["bqkv"], ln=(p["ln_g"], p["ln_b"]),
                 out_dtype=jnp.bfloat16)                               # (B*T, 3D), pre-concat W
    # TODO(synk): attention padding mask (attn_mask) is not applied in the kernel.
    o = attention(qkv, B, T, n_heads, dh)
    out = matmul(o, p["wo"], p["bo"], residual=x2)
    return out.reshape(B, T, D)


def conv_module_forward(x, p):
    """x + PW2(SiLU(BN(DWConv(GLU(PW1(LN(x))))))) — LN/GLU, BN/SiLU, residual all fused."""
    B, T, D = x.shape
    x2 = x.reshape(B * T, D)
    h = matmul_glu(x2, p["pw1_wa"], p["pw1_wg"], p["pw1_ba"], p["pw1_bg"],
                   ln=(p["ln_g"], p["ln_b"]), out_dtype=jnp.bfloat16)   # (B*T, D)
    h = depthwise_conv1d(h.reshape(B, T, D), p["dw_w"], p["dw_b"],
                         p["bn_g"], p["bn_b"])
    h = matmul(h.reshape(B * T, D), p["pw2_w"], p["pw2_b"], residual=x2)
    return h.reshape(B, T, D)


def conformer_block_forward(x, p, n_heads):
    x = ffn_forward(x, p["ffn1"], res_scale=0.5)
    x = mhsa_forward(x, p["mhsa"], n_heads)
    x = conv_module_forward(x, p["conv"])
    x = ffn_forward(x, p["ffn2"], res_scale=0.5)
    return layernorm(x, p["ln_g"], p["ln_b"])


def encoder_forward(x, p, cfg):
    # TODO(synk): Conformer relative positional encoding omitted (sub-module not provided).
    B, T, Din = x.shape
    h = matmul(x.reshape(B * T, Din), p["in_proj"]["w"], p["in_proj"]["b"])
    h = h.reshape(B, T, -1)
    for blk in p["contrastive_blocks"]:
        h = conformer_block_forward(h, blk, cfg["n_heads"])
    context_vectors = h
    for blk in p["mlm_blocks"]:
        h = conformer_block_forward(h, blk, cfg["n_heads"])
    mlm_vectors = h
    return mlm_vectors, context_vectors


def w2v_bert_forward(params, x, mask_key, cfg, attn_mask=None):
    feats = extractor_forward(x, params["extractor"])              # (B, T', ext_dim)
    # TODO(synk): sample_mask(attn_mask) not implemented; demo runs with attn_mask=None.
    target_ctx, discreted_ids, prob_ppl = gumbel_quantizer_forward(
        feats, params["quantizer"], cfg["num_groups"], cfg["num_vars"])
    masked_x, tmask = time_masking(feats, mask_key, cfg["n_time_masks"],
                                   cfg["time_mask_param"], cfg["time_ratio"],
                                   cfg["zero_masking"])
    mlm_vec, ctx_vec = encoder_forward(masked_x, params["encoder"], cfg)
    B, T, D = ctx_vec.shape
    context_vectors = matmul(ctx_vec.reshape(B * T, D),
                             params["contrastive_proj"]["w"],
                             params["contrastive_proj"]["b"]).reshape(B, T, -1)
    mlm_vectors = matmul(mlm_vec.reshape(B * T, D),
                         params["mlm_proj"]["w"],
                         params["mlm_proj"]["b"]).reshape(B, T, -1)
    return ((context_vectors, mlm_vectors, tmask),
            (target_ctx, discreted_ids, prob_ppl))


# ----------------------------------------------------------------------------
# One-time parameter preparation (hoisted out of the per-step forward)
# ----------------------------------------------------------------------------
def prepare_params(p, cfg):
    """Weight concat/split/reshape and bf16 casts done once, not per forward call."""
    bf = lambda a: a.astype(jnp.bfloat16)

    def prep_conv(c):
        w = c["w"]                                   # (O, Cin, kh, kw)
        O, Cin, kh, kw = w.shape
        wm = bf(w.transpose(2, 3, 1, 0).reshape(kh * kw * Cin, O))
        return {"wm": wm, "b": c["b"].astype(jnp.float32), "kh": kh, "kw": kw}

    def prep_ffn(f):
        return {"ln_g": f["ln_g"], "ln_b": f["ln_b"],
                "w1": bf(f["w1"]), "b1": f["b1"],
                "w2": bf(f["w2"]), "b2": f["b2"]}

    def prep_block(blk):
        mh = blk["mhsa"]
        D = mh["wq"].shape[0]
        mhsa = {"ln_g": mh["ln_g"], "ln_b": mh["ln_b"],
                "wqkv": bf(jnp.concatenate([mh["wq"], mh["wk"], mh["wv"]], axis=1)),
                "bqkv": jnp.concatenate([mh["bq"], mh["bk"], mh["bv"]], axis=0),
                "wo": bf(mh["wo"]), "bo": mh["bo"]}
        cv = blk["conv"]
        conv = {"ln_g": cv["ln_g"], "ln_b": cv["ln_b"],
                "pw1_wa": bf(cv["pw1_w"][:, :D]), "pw1_wg": bf(cv["pw1_w"][:, D:]),
                "pw1_ba": cv["pw1_b"][:D], "pw1_bg": cv["pw1_b"][D:],
                "dw_w": cv["dw_w"], "dw_b": cv["dw_b"],
                "bn_g": cv["bn_g"], "bn_b": cv["bn_b"],
                "pw2_w": bf(cv["pw2_w"]), "pw2_b": cv["pw2_b"]}
        return {"ffn1": prep_ffn(blk["ffn1"]), "mhsa": mhsa, "conv": conv,
                "ffn2": prep_ffn(blk["ffn2"]),
                "ln_g": blk["ln_g"], "ln_b": blk["ln_b"]}

    enc = p["encoder"]
    return {
        "extractor": {"conv1": prep_conv(p["extractor"]["conv1"]),
                      "conv2": prep_conv(p["extractor"]["conv2"])},
        "quantizer": {"wp_w": bf(p["quantizer"]["wp_w"]),
                      "wp_b": p["quantizer"]["wp_b"],
                      "vars": p["quantizer"]["vars"]},
        "encoder": {"in_proj": {"w": bf(enc["in_proj"]["w"]), "b": enc["in_proj"]["b"]},
                    "contrastive_blocks": [prep_block(b) for b in enc["contrastive_blocks"]],
                    "mlm_blocks": [prep_block(b) for b in enc["mlm_blocks"]]},
        "contrastive_proj": {"w": bf(p["contrastive_proj"]["w"]),
                             "b": p["contrastive_proj"]["b"]},
        "mlm_proj": {"w": bf(p["mlm_proj"]["w"]), "b": p["mlm_proj"]["b"]},
    }


# ----------------------------------------------------------------------------
# Deterministic parameter init
# ----------------------------------------------------------------------------
def init_params(key, cfg):
    keys = iter(jax.random.split(key, 256))
    nk = lambda: next(keys)

    def lin(din, dout):
        return {"w": jax.random.normal(nk(), (din, dout), jnp.float32) / (din ** 0.5),
                "b": jnp.zeros((dout,), jnp.float32)}

    H, D = cfg["hidden_channels"], cfg["embedding_dim"]
    # kernel=4, stride=2 so subsampled mel dim matches ((in_channels//2-1)//2-1)
    # from the module __init__ formula (both conv layers: F -> F//2 - 1).
    kc = 4
    extractor = {
        "conv1": {"w": jax.random.normal(nk(), (H, 1, kc, kc), jnp.float32) * 0.1,
                  "b": jnp.zeros((H,), jnp.float32)},
        "conv2": {"w": jax.random.normal(nk(), (H, H, kc, kc), jnp.float32) * 0.05,
                  "b": jnp.zeros((H,), jnp.float32)},
    }
    ext_dim = ((cfg["in_channels"] // 2 - 1) // 2 - 1) * H
    G, V, vqd = cfg["num_groups"], cfg["num_vars"], cfg["vq_dim"]
    quantizer = {
        "wp_w": jax.random.normal(nk(), (ext_dim, G * V), jnp.float32) / (ext_dim ** 0.5),
        "wp_b": jnp.zeros((G * V,), jnp.float32),
        "vars": jax.random.normal(nk(), (G * V, vqd // G), jnp.float32) * 0.1,
    }

    def block():
        Fd = D * cfg["n_ffn_factors"]
        K = cfg["kernel_size"]

        def ffn_p():
            return {"ln_g": jnp.ones((D,)), "ln_b": jnp.zeros((D,)),
                    "w1": jax.random.normal(nk(), (D, Fd), jnp.float32) / (D ** 0.5),
                    "b1": jnp.zeros((Fd,)),
                    "w2": jax.random.normal(nk(), (Fd, D), jnp.float32) / (Fd ** 0.5),
                    "b2": jnp.zeros((D,))}

        mh = {"ln_g": jnp.ones((D,)), "ln_b": jnp.zeros((D,))}
        for nm in ("q", "k", "v", "o"):
            mh["w" + nm] = jax.random.normal(nk(), (D, D), jnp.float32) / (D ** 0.5)
            mh["b" + nm] = jnp.zeros((D,))
        conv = {"ln_g": jnp.ones((D,)), "ln_b": jnp.zeros((D,)),
                "pw1_w": jax.random.normal(nk(), (D, 2 * D), jnp.float32) / (D ** 0.5),
                "pw1_b": jnp.zeros((2 * D,)),
                "dw_w": jax.random.normal(nk(), (K, D), jnp.float32) * 0.1,
                "dw_b": jnp.zeros((D,)),
                # TODO(synk): BatchNorm1d modeled with identity running stats (fresh eval model).
                "bn_g": jnp.ones((D,)), "bn_b": jnp.zeros((D,)),
                "pw2_w": jax.random.normal(nk(), (D, D), jnp.float32) / (D ** 0.5),
                "pw2_b": jnp.zeros((D,))}
        return {"ffn1": ffn_p(), "mhsa": mh, "conv": conv, "ffn2": ffn_p(),
                "ln_g": jnp.ones((D,)), "ln_b": jnp.zeros((D,))}

    encoder = {"in_proj": lin(ext_dim, D),
               "contrastive_blocks": [block() for _ in range(cfg["n_contrastive_blocks"])],
               "mlm_blocks": [block() for _ in range(cfg["n_mlm_blocks"])]}
    return {"extractor": extractor, "quantizer": quantizer, "encoder": encoder,
            "contrastive_proj": lin(D, vqd), "mlm_proj": lin(D, cfg["num_vars"])}


# ----------------------------------------------------------------------------
if __name__ == "__main__":
    cfg = dict(
        in_channels=16, hidden_channels=32, embedding_dim=32, n_heads=4,
        kernel_size=5, n_ffn_factors=2, n_contrastive_blocks=2, n_mlm_blocks=2,
        num_groups=2, num_vars=16, vq_dim=16,
        n_time_masks=2, time_mask_param=3, time_ratio=1.0, zero_masking=True,
    )
    key = jax.random.PRNGKey(0)
    pkey, xkey, mkey = jax.random.split(key, 3)
    params = prepare_params(init_params(pkey, cfg), cfg)   # one-time weight prep (hoisted)

    B, T_in = 2, 32
    x = jax.random.normal(xkey, (B, T_in, cfg["in_channels"]), jnp.float32)

    (ctx, mlm, tmask), (tgt, ids, ppl) = w2v_bert_forward(params, x, mkey, cfg, attn_mask=None)
    jax.block_until_ready((ctx, mlm, tmask, tgt, ids, ppl))

    assert ctx.shape == (B, 6, cfg["vq_dim"])
    assert mlm.shape == (B, 6, cfg["num_vars"])
    assert tmask.shape == (B, 6)
    assert tgt.shape == (B, 6, cfg["vq_dim"])
    assert ids.shape == (B, 6, cfg["num_groups"])
    assert ppl.shape == ()
    print("KERNEL_OK")
</pallas_src>

<mosaic_0001>
module attributes {stable_mosaic.version = 11 : i64} {
  func.func @_mm_kernel(%arg0: i32, %arg1: i32, %arg2: i32, %arg3: memref<224x128xbf16, #tpu.memory_space<vmem>>, %arg4: memref<128x128xbf16, #tpu.memory_space<vmem>>, %arg5: memref<1x128xf32, #tpu.memory_space<vmem>>, %arg6: memref<224x128xbf16, #tpu.memory_space<vmem>>, %arg7: memref<224x128xf32, #tpu.memory_space<vmem>>) attributes {dimension_semantics = [#tpu.dimension_semantics<parallel>, #tpu.dimension_semantics<parallel>, #tpu.dimension_semantics<arbitrary>], iteration_bounds = array<i64: 1, 1, 1>, scalar_prefetch = 0 : i64, scratch_operands = 1 : i64, tpu.core_type = #tpu.core_type<tc>, window_params = [{transform_indices = @transform_0, window_bounds = array<i64: 224, 128>}, {transform_indices = @transform_1, window_bounds = array<i64: 128, 128>}, {transform_indices = @transform_2, window_bounds = array<i64: 1, 128>}, {transform_indices = @transform_3, window_bounds = array<i64: 224, 128>}]} {
    %c0_i32 = arith.constant 0 : i32
    %0 = arith.cmpi eq, %arg2, %c0_i32 : i32
    %1 = arith.extui %0 : i1 to i32
    %c0_i32_0 = arith.constant 0 : i32
    %2 = arith.cmpi ne, %1, %c0_i32_0 : i32
    scf.if %2 {
      %cst_10 = arith.constant 0.000000e+00 : f32
      %12 = vector.broadcast %cst_10 : f32 to vector<224x128xf32>
      %c0_11 = arith.constant 0 : index
      %c0_12 = arith.constant 0 : index
      %13 = vector.load %arg7[%c0_11, %c0_12] : memref<224x128xf32, #tpu.memory_space<vmem>>, vector<224x128xf32>
      tpu.vector_store %arg7[%c0_11, %c0_12], %12 {strides = array<i32>} : memref<224x128xf32, #tpu.memory_space<vmem>>, vector<224x128xf32>,
    } else {
    }
    %c0 = arith.constant 0 : index
    %c0_1 = arith.constant 0 : index
    %3 = vector.load %arg7[%c0, %c0_1] : memref<224x128xf32, #tpu.memory_space<vmem>>, vector<224x128xf32>
    %c0_2 = arith.constant 0 : index
    %c0_3 = arith.constant 0 : index
    %4 = vector.load %arg3[%c0_2, %c0_3] : memref<224x128xbf16, #tpu.memory_space<vmem>>, vector<224x128xbf16>
    %c0_4 = arith.constant 0 : index
    %c0_5 = arith.constant 0 : index
    %5 = vector.load %arg4[%c0_4, %c0_5] : memref<128x128xbf16, #tpu.memory_space<vmem>>, vector<128x128xbf16>
    %cst = arith.constant dense<0.000000e+00> : vector<224x128xf32>
    %6 = tpu.matmul %4, %5, %cst {dimension_numbers = #tpu.dot_dimension_numbers<[1], [0], [0], [1], [0, 0, 1, 1], [], []>} : vector<224x128xbf16>, vector<128x128xbf16>, vector<224x128xf32> -> vector<224x128xf32>
    %7 = arith.addf %3, %6 : vector<224x128xf32>
    %c0_6 = arith.constant 0 : index
    %c0_7 = arith.constant 0 : index
    %8 = vector.load %arg7[%c0_6, %c0_7] : memref<224x128xf32, #tpu.memory_space<vmem>>, vector<224x128xf32>
    tpu.vector_store %arg7[%c0_6, %c0_7], %7 {strides = array<i32>} : memref<224x128xf32, #tpu.memory_space<vmem>>, vector<224x128xf32>,
    %c0_i32_8 = arith.constant 0 : i32
    %9 = arith.cmpi eq, %arg2, %c0_i32_8 : i32
    %10 = arith.extui %9 : i1 to i32
    %c0_i32_9 = arith.constant 0 : i32
    %11 = arith.cmpi ne, %10, %c0_i32_9 : i32
    scf.if %11 {
      %c0_10 = arith.constant 0 : index
      %c0_11 = arith.constant 0 : index
      %12 = vector.load %arg7[%c0_10, %c0_11] : memref<224x128xf32, #tpu.memory_space<vmem>>, vector<224x128xf32>
      %c0_12 = arith.constant 0 : index
      %c0_13 = arith.constant 0 : index
      %13 = vector.load %arg5[%c0_12, %c0_13] : memref<1x128xf32, #tpu.memory_space<vmem>>, vector<1x128xf32>
      %14 = vector.broadcast %13 : vector<1x128xf32> to vector<224x128xf32>
      %15 = arith.addf %12, %14 : vector<224x128xf32>
      %cst_14 = arith.constant 0.000000e+00 : f32
      %16 = vector.broadcast %cst_14 : f32 to vector<224x128xf32>
      %17 = arith.maximumf %15, %16 : vector<224x128xf32>
      %18 = arith.truncf %17 : vector<224x128xf32> to vector<224x128xbf16>
      %c0_15 = arith.constant 0 : index
      %c0_16 = arith.constant 0 : index
      %19 = vector.load %arg6[%c0_15, %c0_16] : memref<224x128xbf16, #tpu.memory_space<vmem>>, vector<224x128xbf16>
      tpu.vector_store %arg6[%c0_15, %c0_16], %18 {strides = array<i32>} : memref<224x128xbf16, #tpu.memory_space<vmem>>, vector<224x128xbf16>,
    } else {
    }
    return
  }
  func.func @transform_0(%arg0: i32, %arg1: i32, %arg2: i32) -> (i32, i32) {
    %c0_i32 = arith.constant 0 : i32
    return %arg0, %arg2 : i32, i32
  }
  func.func @transform_1(%arg0: i32, %arg1: i32, %arg2: i32) -> (i32, i32) {
    %c0_i32 = arith.constant 0 : i32
    return %arg2, %arg1 : i32, i32
  }
  func.func @transform_2(%arg0: i32, %arg1: i32, %arg2: i32) -> (i32, i32) {
    %c0_i32 = arith.constant 0 : i32
    %c0_i32_0 = arith.constant 0 : i32
    return %c0_i32, %arg1 : i32, i32
  }
  func.func @transform_3(%arg0: i32, %arg1: i32, %arg2: i32) -> (i32, i32) {
    %c0_i32 = arith.constant 0 : i32
    return %arg0, %arg1 : i32, i32
  }
}

</mosaic_0001>

<bundles_post_ra>
// kernel: tpu_custom_call.1
= control target key start
LH: loop header
LB: loop body
LE: loop exit
PB: predicated region body
PF: predicated region fallthrough
CT: control target
= control target key end

     0   :  { %8 = vsyncpa [#allocation4], 0  ;;  %s1179_s0 = inlined_call_operand.hbm [shape: bf16[224,128], index: 0, kind: input, shape index: {}]   ;;  %s1180_s1 = inlined_call_operand.hbm [shape: bf16[128,128], index: 1, kind: input, shape index: {}]   ;;  %s1181_s2 = inlined_call_operand.vmem [shape: f32[1,128], index: 2, kind: input, shape index: {}]   ;;  %s1182_s3 = inlined_call_operand.hbm [shape: bf16[224,128], index: 3, kind: output, shape index: {}]  }
   0x1   :  { %9 = vsyncpa [#allocation7], 0 }
   0x2   :  { %10 = vsyncpa [#allocation5], 0  ;;  %s1076_s12 = smov [#allocation3]   ;;  %s1004_s16 = scalar_lea.hbm %s1179_s0, 1792 }
   0x3   :  { %s16_s13 = sshll.u32 %s1076_s12, 4  ;;  %p1005_p0 = scmp.ne.s32.totalorder %s1179_s0, %s1004_s16  ;;  %s17_s13 = int_to_ptr.vmem [resolvable:$true] %s16_s13 }
   0x4   :  { %p1008_p1 = scmp.lt.u32.totalorder %s1004_s16, %s1179_s0 }
   0x6   :  { %p1010_p2 = pnand %p1008_p1, %p1005_p0 }
   0x8   :  { %1013 = shalt.err (!%p1010_p2)
}
   0x9   :  { %s1014_s21 = scalar_lea.vmem %s17_s13, 1792  ;;  %p1019_p4 = scmp.lt.s32.totalorder %s17_s13, %s17_s13 }
   0xa   :  { %p1015_p3 = scmp.ne.s32.totalorder %s17_s13, %s1014_s21  ;;  %p1020_p5 = scmp.lt.s32.totalorder %s1014_s21, %s1014_s21 }
   0xc   :  { %p1021_p6 = por %p1020_p5, %p1019_p4 }
   0xe   :  { %p1022_p7 = pnand %p1021_p6, %p1015_p3 }
  0x10   :  { %1025 = shalt.err (!%p1022_p7)
}
  0x11   :  { %s1077_s22 = smov 64   ;;  %s1078_s23 = smov 4  }
  0x12   :  { %22 = dma.hbm_to_vmem [thread:$0]  %s1179_s0, 1792, %s17_s13, [#allocation4], %s1077_s22, %s1077_s22, %s1078_s23  }
  0x13   :  { %s1079_s26 = smov [#allocation6]   ;;  %s1026_s30 = scalar_lea.hbm %s1180_s1, 1024 }
  0x14   :  { %s28_s27 = sshll.u32 %s1079_s26, 4  ;;  %p1027_p8 = scmp.ne.s32.totalorder %s1180_s1, %s1026_s30  ;;  %s29_s27 = int_to_ptr.vmem [resolvable:$true] %s28_s27 }
  0x15   :  { %p1030_p9 = scmp.lt.u32.totalorder %s1026_s30, %s1180_s1 }
  0x17   :  { %p1032_p10 = pnand %p1030_p9, %p1027_p8 }
  0x19   :  { %1035 = shalt.err (!%p1032_p10)
}
  0x1a   :  { %s1036_s8 = scalar_lea.vmem %s29_s27, 1024  ;;  %p1041_p12 = scmp.lt.s32.totalorder %s29_s27, %s29_s27 }
  0x1b   :  { %p1037_p11 = scmp.ne.s32.totalorder %s29_s27, %s1036_s8  ;;  %p1042_p13 = scmp.lt.s32.totalorder %s1036_s8, %s1036_s8 }
  0x1d   :  { %p1043_p0 = por %p1042_p13, %p1041_p12 }
  0x1f   :  { %p1044_p1 = pnand %p1043_p0, %p1037_p11 }
  0x21   :  { %1047 = shalt.err (!%p1044_p1)
}
  0x22   :  { %34 = dma.hbm_to_vmem [thread:$0]  %s1180_s1, 1024, %s29_s27, [#allocation7], %s1077_s22, %s1077_s22, %s1078_s23  }
  0x23   :  { %1070 = dma.done.wait [#allocation4], 1792  }
  0x24   :  { %1071 = vsyncadd [#allocation4], 4294965504 }
  0x25   :  { %1072 = dma.done.wait [#allocation7], 1024  }
  0x26   :  { %1073 = vsyncadd [#allocation7], 4294966272  ;;  %v982_v0 = vld [vmem:[#allocation6] sm:$0xff]   ;;  %v983_v1 = vld [vmem:[#allocation6 + $0x8] sm:$0xff]  }
  0x27   :  { %917 = vmatprep.subr.bf16.mxu0 %v982_v0  ;;  %961 = vmatprep.subr.bf16.mxu1 %v982_v0  ;;  %v984_v2 = vld [vmem:[#allocation6 + $0x10] sm:$0xff]   ;;  %v985_v3 = vld [vmem:[#allocation6 + $0x18] sm:$0xff]   ;;  %v986_v6 = vld [vmem:[#allocation6 + $0x20] sm:$0xff]  }
  0x28   :  { %918 = vmatpush3.bf16.msra.mxu0 %v982_v0  ;;  %969 = vmatpush3.bf16.msra.mxu1 %v982_v0  ;;  %v990_v4 = vld [vmem:[#allocation3] sm:$0xff]   ;;  %v987_v7 = vld [vmem:[#allocation6 + $0x28] sm:$0xff]   ;;  %v989_v9 = vld [vmem:[#allocation6 + $0x38] sm:$0xff]  }
  0x29   :  { %919 = vmatprep.subr.bf16.mxu0 %v983_v1  ;;  %962 = vmatprep.subr.bf16.mxu1 %v983_v1  ;;  %v992_v5 = vld [vmem:[#allocation3 + $0x40] sm:$0xff]   ;;  %v991_v10 = vld [vmem:[#allocation3 + $0x8] sm:$0xff]   ;;  %v994_v12 = vld [vmem:[#allocation3 + $0x10] sm:$0xff]  }
  0x2a   :  { %933 = vmatprep.mubr.bf16.mxu0 %v990_v4  ;;  %949 = vmatprep.mubr.bf16.mxu1 %v992_v5  ;;  %v988_v8 = vld [vmem:[#allocation6 + $0x30] sm:$0xff]   ;;  %v993_v11 = vld [vmem:[#allocation3 + $0x48] sm:$0xff]   ;;  %v996_v13 = vld [vmem:[#allocation3 + $0x50] sm:$0xff]  }
  0x2b   :  { %v995_v14 = vld [vmem:[#allocation3 + $0x18] sm:$0xff]   ;;  %v998_v16 = vld [vmem:[#allocation3 + $0x20] sm:$0xff]   ;;  %v999_v18 = vld [vmem:[#allocation3 + $0x28] sm:$0xff]  }
  0x2c   :  { %920 = vmatpush3.bf16.msra.mxu0 %v983_v1  ;;  %970 = vmatpush3.bf16.msra.mxu1 %v983_v1  ;;  %v997_v15 = vld [vmem:[#allocation3 + $0x58] sm:$0xff]   ;;  %v1000_v17 = vld [vmem:[#allocation3 + $0x60] sm:$0xff]   ;;  %v1001_v19 = vld [vmem:[#allocation3 + $0x68] sm:$0xff]  }
  0x2d   :  { %921 = vmatprep.subr.bf16.mxu0 %v984_v2  ;;  %963 = vmatprep.subr.bf16.mxu1 %v984_v2  ;;  %v1002_v20 = vld [vmem:[#allocation3 + $0x30] sm:$0xff]   ;;  %v1003_v21 = vld [vmem:[#allocation3 + $0x38] sm:$0xff]   ;;  %v1134_v22 = vld [vmem:[%s1181_s2] ss:$0 sm:$0xff]  ;;  %s1080_s2 = smov [#allocation8]  }
  0x2e   :  { %s720_s11 = sshll.u32 %s1080_s2, 4  ;;  %s721_s11 = int_to_ptr.vmem [resolvable:$true] %s720_s11 }
  0x2f   :  { %s1048_s12 = scalar_lea.vmem %s721_s11, 1792  ;;  %p1053_p3 = scmp.lt.s32.totalorder %s721_s11, %s721_s11 }
  0x30   :  { %922 = vmatpush3.bf16.msra.mxu0 %v984_v2  ;;  %971 = vmatpush3.bf16.msra.mxu1 %v984_v2  ;;  %p1049_p2 = scmp.ne.s32.totalorder %s721_s11, %s1048_s12  ;;  %p1054_p4 = scmp.lt.s32.totalorder %s1048_s12, %s1048_s12 }
  0x31   :  { %923 = vmatprep.subr.bf16.mxu0 %v985_v3  ;;  %964 = vmatprep.subr.bf16.mxu1 %v985_v3 }
  0x32   :  { %p1055_p5 = por %p1054_p4, %p1053_p3 }
  0x34   :  { %924 = vmatpush3.bf16.msra.mxu0 %v985_v3  ;;  %972 = vmatpush3.bf16.msra.mxu1 %v985_v3  ;;  %p1056_p6 = pnand %p1055_p5, %p1049_p2 }
  0x35   :  { %925 = vmatprep.subr.bf16.mxu0 %v986_v6  ;;  %965 = vmatprep.subr.bf16.mxu1 %v986_v6 }
  0x38   :  { %926 = vmatpush3.bf16.msra.mxu0 %v986_v6  ;;  %973 = vmatpush3.bf16.msra.mxu1 %v986_v6 }
  0x39   :  { %927 = vmatprep.subr.bf16.mxu0 %v987_v7  ;;  %966 = vmatprep.subr.bf16.mxu1 %v987_v7 }
  0x3c   :  { %928 = vmatpush3.bf16.msra.mxu0 %v987_v7  ;;  %974 = vmatpush3.bf16.msra.mxu1 %v987_v7 }
  0x3d   :  { %929 = vmatprep.subr.bf16.mxu0 %v988_v8  ;;  %967 = vmatprep.subr.bf16.mxu1 %v988_v8 }
  0x40   :  { %930 = vmatpush3.bf16.msra.mxu0 %v988_v8  ;;  %975 = vmatpush3.bf16.msra.mxu1 %v988_v8 }
  0x41   :  { %931 = vmatprep.subr.bf16.mxu0 %v989_v9  ;;  %968 = vmatprep.subr.bf16.mxu1 %v989_v9 }
  0x44   :  { %932 = vmatpush3.bf16.msra.mxu0 %v989_v9  ;;  %976 = vmatpush3.bf16.msra.mxu1 %v989_v9 }
  0x47   :  { %934 = vmatmul.mubr.bf16.vlgmr.msra.gmra.mrb[0].mxu0 %v991_v10  ;;  %950 = vmatmul.mubr.bf16.vlgmr.msra.gmra.mrb[0].mxu1 %v993_v11 }
  0x48   :  { %937 = vmatprep.mubr.bf16.mxu0 %v994_v12  ;;  %953 = vmatprep.mubr.bf16.mxu1 %v996_v13 }
  0x4f   :  { %938 = vmatmul.mubr.bf16.gmra.mrb[4].mxu0 %v995_v14  ;;  %954 = vmatmul.mubr.bf16.gmra.mrb[4].mxu1 %v997_v15 }
  0x50   :  { %941 = vmatprep.mubr.bf16.mxu0 %v998_v16  ;;  %957 = vmatprep.mubr.bf16.mxu1 %v1000_v17 }
  0x57   :  { %942 = vmatmul.mubr.bf16.gmra.mrb[8].mxu0 %v999_v18  ;;  %958 = vmatmul.mubr.bf16.gmra.mrb[8].mxu1 %v1001_v19 }
  0x58   :  { %945 = vmatprep.mubr.bf16.mxu0 %v1002_v20 }
  0x5f   :  { %946 = vmatmul.mubr.bf16.gmra.mrb[12].mxu0 %v1003_v21 }
 0x11a   :  { %v935_v23 = vpop.f32.mrb[0].mxu0  ;;  %v951_v24 = vpop.f32.mrb[0].mxu1 }
 0x11b   :  { %v521_v25 = vadd.f32 %v935_v23, %v1134_v22  ;;  %v314_v26 = vpop.f32.mrb[1].mxu0  ;;  %v537_v27 = vadd.f32 %v951_v24, %v1134_v22  ;;  %v378_v28 = vpop.f32.mrb[1].mxu1 }
 0x11c   :  { %v519_v29 = vadd.f32 %v1134_v22, %v314_v26  ;;  %v936_v30 = vpop.f32.mrb[2].mxu0  ;;  %v535_v31 = vadd.f32 %v1134_v22, %v378_v28  ;;  %v952_v32 = vpop.f32.mrb[2].mxu1 }
 0x11d   :  { %v522_v33 = vadd.f32 %v936_v30, %v1134_v22  ;;  %v317_v34 = vpop.f32.mrb[3].mxu0  ;;  %v565_v35 = vmax.f32 %v537_v27, 0.0  ;;  %v538_v36 = vadd.f32 %v952_v32, %v1134_v22  ;;  %v381_v37 = vpop.f32.mrb[3].mxu1  ;;  %v549_v41 = vmax.f32 %v521_v25, 0.0 }
 0x11e   :  { %v520_v38 = vadd.f32 %v1134_v22, %v317_v34  ;;  %v563_v39 = vmax.f32 %v535_v31, 0.0  ;;  %v536_v40 = vadd.f32 %v1134_v22, %v381_v37  ;;  %v547_v44 = vmax.f32 %v519_v29, 0.0 }
 0x11f   :  { %v550_v42 = vmax.f32 %v522_v33, 0.0  ;;  %v566_v43 = vmax.f32 %v538_v36, 0.0 }
 0x120   :  { %v548_v45 = vmax.f32 %v520_v38, 0.0  ;;  %v564_v46 = vmax.f32 %v536_v40, 0.0 }
 0x121   :  { %v820_v47 = vpack.c.bf16 %v550_v42, %v549_v41  ;;  %v860_v48 = vpack.c.bf16 %v566_v43, %v565_v35 }
 0x122   :  { %v815_v49 = vpack.c.bf16 %v548_v45, %v547_v44  ;;  %v939_v50 = vpop.f32.mrb[4].mxu0  ;;  %v855_v51 = vpack.c.bf16 %v564_v46, %v563_v39  ;;  %v955_v52 = vpop.f32.mrb[4].mxu1 }
 0x123   :  { %882 = vst [vmem:[#allocation8 + $0x8] sm:$0xff] %v820_v47   ;;  %890 = vst [vmem:[#allocation8 + $0x48] sm:$0xff] %v860_v48   ;;  %v525_v53 = vadd.f32 %v939_v50, %v1134_v22  ;;  %v330_v54 = vpop.f32.mrb[5].mxu0  ;;  %v541_v55 = vadd.f32 %v955_v52, %v1134_v22  ;;  %v394_v56 = vpop.f32.mrb[5].mxu1 }
 0x124   :  { %816 = vst [vmem:[#allocation8] sm:$0xff] %v815_v49   ;;  %889 = vst [vmem:[#allocation8 + $0x40] sm:$0xff] %v855_v51   ;;  %v523_v57 = vadd.f32 %v1134_v22, %v330_v54  ;;  %v940_v58 = vpop.f32.mrb[6].mxu0  ;;  %v539_v59 = vadd.f32 %v1134_v22, %v394_v56  ;;  %v956_v60 = vpop.f32.mrb[6].mxu1 }
 0x125   :  { %v526_v61 = vadd.f32 %v940_v58, %v1134_v22  ;;  %v333_v62 = vpop.f32.mrb[7].mxu0  ;;  %v569_v63 = vmax.f32 %v541_v55, 0.0  ;;  %v542_v0 = vadd.f32 %v956_v60, %v1134_v22  ;;  %v397_v1 = vpop.f32.mrb[7].mxu1  ;;  %v553_v5 = vmax.f32 %v525_v53, 0.0 }
 0x126   :  { %v524_v2 = vadd.f32 %v1134_v22, %v333_v62  ;;  %v567_v3 = vmax.f32 %v539_v59, 0.0  ;;  %v540_v4 = vadd.f32 %v1134_v22, %v397_v1  ;;  %v551_v8 = vmax.f32 %v523_v57, 0.0 }
 0x127   :  { %v554_v6 = vmax.f32 %v526_v61, 0.0  ;;  %v570_v7 = vmax.f32 %v542_v0, 0.0 }
 0x128   :  { %v552_v9 = vmax.f32 %v524_v2, 0.0  ;;  %v568_v10 = vmax.f32 %v540_v4, 0.0 }
 0x129   :  { %v830_v11 = vpack.c.bf16 %v554_v6, %v553_v5  ;;  %v870_v12 = vpack.c.bf16 %v570_v7, %v569_v63 }
 0x12a   :  { %v825_v13 = vpack.c.bf16 %v552_v9, %v551_v8  ;;  %v943_v14 = vpop.f32.mrb[8].mxu0  ;;  %v865_v15 = vpack.c.bf16 %v568_v10, %v567_v3  ;;  %v959_v16 = vpop.f32.mrb[8].mxu1 }
 0x12b   :  { %884 = vst [vmem:[#allocation8 + $0x18] sm:$0xff] %v830_v11   ;;  %892 = vst [vmem:[#allocation8 + $0x58] sm:$0xff] %v870_v12   ;;  %v529_v17 = vadd.f32 %v943_v14, %v1134_v22  ;;  %v346_v18 = vpop.f32.mrb[9].mxu0  ;;  %v545_v19 = vadd.f32 %v959_v16, %v1134_v22  ;;  %v410_v20 = vpop.f32.mrb[9].mxu1 }
 0x12c   :  { %883 = vst [vmem:[#allocation8 + $0x10] sm:$0xff] %v825_v13   ;;  %891 = vst [vmem:[#allocation8 + $0x50] sm:$0xff] %v865_v15   ;;  %v527_v21 = vadd.f32 %v1134_v22, %v346_v18  ;;  %v944_v23 = vpop.f32.mrb[10].mxu0  ;;  %v543_v24 = vadd.f32 %v1134_v22, %v410_v20  ;;  %v960_v25 = vpop.f32.mrb[10].mxu1 }
 0x12d   :  { %v530_v26 = vadd.f32 %v944_v23, %v1134_v22  ;;  %v349_v27 = vpop.f32.mrb[11].mxu0  ;;  %v573_v28 = vmax.f32 %v545_v19, 0.0  ;;  %v546_v29 = vadd.f32 %v960_v25, %v1134_v22  ;;  %v413_v30 = vpop.f32.mrb[11].mxu1  ;;  %v557_v34 = vmax.f32 %v529_v17, 0.0 }
 0x12e   :  { %v528_v31 = vadd.f32 %v1134_v22, %v349_v27  ;;  %v571_v32 = vmax.f32 %v543_v24, 0.0  ;;  %v544_v33 = vadd.f32 %v1134_v22, %v413_v30  ;;  %v555_v37 = vmax.f32 %v527_v21, 0.0 }
 0x12f   :  { %v558_v35 = vmax.f32 %v530_v26, 0.0  ;;  %v574_v36 = vmax.f32 %v546_v29, 0.0 }
 0x130   :  { %v556_v38 = vmax.f32 %v528_v31, 0.0  ;;  %v572_v39 = vmax.f32 %v544_v33, 0.0 }
 0x131   :  { %v840_v40 = vpack.c.bf16 %v558_v35, %v557_v34  ;;  %v880_v41 = vpack.c.bf16 %v574_v36, %v573_v28 }
 0x132   :  { %v835_v42 = vpack.c.bf16 %v556_v38, %v555_v37  ;;  %v947_v43 = vpop.f32.mrb[12].mxu0  ;;  %v875_v44 = vpack.c.bf16 %v572_v39, %v571_v32 }
 0x133   :  { %886 = vst [vmem:[#allocation8 + $0x28] sm:$0xff] %v840_v40   ;;  %894 = vst [vmem:[#allocation8 + $0x68] sm:$0xff] %v880_v41   ;;  %v533_v45 = vadd.f32 %v947_v43, %v1134_v22  ;;  %v362_v46 = vpop.f32.mrb[13].mxu0 }
 0x134   :  { %885 = vst [vmem:[#allocation8 + $0x20] sm:$0xff] %v835_v42   ;;  %893 = vst [vmem:[#allocation8 + $0x60] sm:$0xff] %v875_v44   ;;  %v531_v47 = vadd.f32 %v1134_v22, %v362_v46  ;;  %v948_v48 = vpop.f32.mrb[14].mxu0 }
 0x135   :  { %v534_v49 = vadd.f32 %v948_v48, %v1134_v22  ;;  %v365_v50 = vpop.f32.mrb[15].mxu0  ;;  %v561_v52 = vmax.f32 %v533_v45, 0.0 }
 0x136   :  { %v532_v51 = vadd.f32 %v1134_v22, %v365_v50  ;;  %v559_v54 = vmax.f32 %v531_v47, 0.0 }
 0x137   :  { %v562_v53 = vmax.f32 %v534_v49, 0.0 }
 0x138   :  { %v560_v55 = vmax.f32 %v532_v51, 0.0 }
 0x139   :  { %v850_v56 = vpack.c.bf16 %v562_v53, %v561_v52 }
 0x13a   :  { %v845_v57 = vpack.c.bf16 %v560_v55, %v559_v54 }
 0x13b   :  { %888 = vst [vmem:[#allocation8 + $0x38] sm:$0xff] %v850_v56  }
 0x13c   :  { %887 = vst [vmem:[#allocation8 + $0x30] sm:$0xff] %v845_v57  }
 0x13d   :  { %1059 = shalt.err (!%p1056_p6)
}
 0x13e   :  { %s1060_s15 = scalar_lea.hbm %s1182_s3, 1792 }
 0x13f   :  { %p1061_p7 = scmp.ne.s32.totalorder %s1182_s3, %s1060_s15  ;;  %p1064_p8 = scmp.lt.u32.totalorder %s1060_s15, %s1182_s3 }
 0x141   :  { %p1066_p9 = pnand %p1064_p8, %p1061_p7 }
 0x143   :  { %1069 = shalt.err (!%p1066_p9)
}
 0x144   :  { %726 = dma.vmem_to_hbm [thread:$0]  %s721_s11, 1792, %s1182_s3, [#allocation5], %s1077_s22, %s1077_s22, %s1078_s23  }
 0x145   :  { %1074 = dma.done.wait [#allocation5], 1792  }
 0x146   :  { %1075 = vsyncadd [#allocation5], 4294965504 }
 0x147   :  { %730 = vsyncpa [#allocation4], 1 }
 0x148   :  { %731 = vsyncpa [#allocation7], 1 }
 0x149   :  { %732 = vsyncpa [#allocation5], 1 }

</bundles_post_ra>
